<compile_context>
chip_gen: v7x
topology: tpu7x:2x2x1
jax: 0.10.0
libtpu: 0.0.40
codegen_flags: <defaults>
</compile_context>

<pallas_src>
import functools

import jax
import jax.numpy as jnp
from jax.experimental import pallas as pl
from jax.experimental.pallas import tpu as pltpu


def _round_up(x, m):
    return (x + m - 1) // m * m


def _pick_hidden_tile(hp, cap):
    """Largest multiple of 128 <= cap that divides hp (hp is a multiple of 128)."""
    th = max(128, min(hp, cap))
    while hp % th:
        th -= 128
    return th


def _vmem_capacity_bytes():
    try:
        return int(pltpu.get_tpu_info().vmem_capacity_bytes)
    except Exception:
        return 64 << 20  # conservative (v7x per-TC) fallback, e.g. interpret mode


def _estimate_vmem(tm, th, cp, itemsize, out_itemsize):
    """Pipeline-buffer footprint for one (tm, th) tiling choice."""
    return (2 * tm * cp * itemsize                 # x row tiles (double buffered)
            + 2 * tm * cp * out_itemsize           # output tiles (double buffered)
            + 2 * (cp * th + th * cp) * itemsize   # W1/W2 chunks (double buffered)
            + 2 * (8 * th + 8 * cp) * 4            # bias tiles (sublane padded)
            + tm * cp * 4                          # f32 accumulator scratch
            + tm * th * (4 + itemsize))            # hidden slab (f32 + bf16 copy)


def _dropout(y, row_tile, seed_ref, *, drop_p, tm, use_hw_prng):
    """Inverted dropout.  Mask is a stateless hash of (global row, col, seed), so
    it is independent of the tiling choice.
    TODO(synk): matches torch's dropout statistics, not its exact RNG stream."""
    if drop_p <= 0.0:
        return y
    if drop_p >= 1.0:
        return jnp.zeros_like(y)
    keep_thr = min(int(round((1.0 - drop_p) * (2 ** 31))), 2 ** 31 - 1)
    if use_hw_prng:
        # Hardware PRNG: frees VALU slots in the epilogue (matters most on v5e).
        pltpu.prng_seed(seed_ref[0] + row_tile)
        u = pltpu.bitcast(pltpu.prng_random_bits(y.shape), jnp.uint32)
    else:
        row = jax.lax.broadcasted_iota(jnp.int32, y.shape, 0)
        col = jax.lax.broadcasted_iota(jnp.int32, y.shape, 1)
        grow = (row + row_tile * tm).astype(jnp.uint32)   # global row: no N*C overflow
        u = (grow * jnp.uint32(0x9E3779B1)
             ^ col.astype(jnp.uint32) * jnp.uint32(0x85EBCA77)
             ^ seed_ref[0].astype(jnp.uint32))
        # lowbias32 mixing (elementwise VPU ops only; portable / interpret-safe).
        u = u ^ (u >> 16)
        u = u * jnp.uint32(0x7FEB352D)
        u = u ^ (u >> 15)
        u = u * jnp.uint32(0x846CA68B)
        u = u ^ (u >> 16)
    r = (u >> 1).astype(jnp.int32)                        # 31 uniform bits, >= 0
    keep = r < keep_thr                                   # P(keep) = 1 - p
    return jnp.where(keep, y * (1.0 / (1.0 - drop_p)), 0.0)


def _ff_kernel(seed_ref, x_ref, w1_ref, b1_ref, w2_ref, b2_ref, o_ref, *scratch,
               drop_p, compute_dtype, num_k, tm, use_hw_prng):
    # NOTE: bind program_id at the top level of the kernel (never inside a
    # pl.when body) -- required for the interpret-mode fallback.
    i = pl.program_id(0)

    # First linear + ReLU on this hidden chunk (bf16 MXU matmul, f32 accumulate).
    h = jnp.dot(x_ref[...], w1_ref[...], preferred_element_type=jnp.float32)
    h = jnp.maximum(h + b1_ref[...], 0.0)                 # (tm, th) + (1, th)

    # Second linear: partial product over this hidden chunk.
    partial = jnp.dot(h.astype(compute_dtype), w2_ref[...],
                      preferred_element_type=jnp.float32)

    def epilogue(y):
        y = y + b2_ref[...]                               # (tm, Cp) + (1, Cp)
        y = _dropout(y, i, seed_ref, drop_p=drop_p, tm=tm, use_hw_prng=use_hw_prng)
        o_ref[...] = y.astype(o_ref.dtype)

    if num_k == 1:
        # Weights fully VMEM-resident: no accumulator round-trip at all.
        epilogue(partial)
    else:
        acc_ref = scratch[0]
        k = pl.program_id(1)

        @pl.when(k == 0)
        def _():
            acc_ref[...] = jnp.zeros_like(acc_ref)

        @pl.when(k < num_k - 1)
        def _():
            acc_ref[...] += partial

        # Fused final accumulate + epilogue (saves one (tm, Cp) f32 store+reload).
        @pl.when(k == num_k - 1)
        def _():
            epilogue(acc_ref[...] + partial)


def prepare_ff_params(w1, b1, w2, b2, *, compute_dtype=jnp.bfloat16):
    """Pad/cast weights once; reuse across forward calls (avoids re-streaming
    ~3x the weight bytes through HBM every step)."""
    C, H = w1.shape
    Cp = _round_up(C, 128)
    Hp = _round_up(H, 128)
    w1_p = jnp.pad(w1.astype(compute_dtype), ((0, Cp - C), (0, Hp - H)))
    b1_p = jnp.pad(b1.astype(jnp.float32), (0, Hp - H)).reshape(1, Hp)
    w2_p = jnp.pad(w2.astype(compute_dtype), ((0, Hp - H), (0, Cp - C)))
    b2_p = jnp.pad(b2.astype(jnp.float32), (0, Cp - C)).reshape(1, Cp)
    return dict(w1=w1_p, b1=b1_p, w2=w2_p, b2=b2_p, C=C, H=H, Cp=Cp, Hp=Hp,
                compute_dtype=compute_dtype)


def feed_forward(x, params, *, drop_p=0.0, seed=0, tm=256, th_cap=512,
                 out_dtype=None, use_hw_prng=False):
    """x: (B, T, C) -> (B, T, C).  `params` from prepare_ff_params().
    out_dtype=jnp.bfloat16 halves output HBM traffic when the consumer allows."""
    B, T, C = x.shape
    assert C == params["C"], "feature dim mismatch with prepared params"
    compute_dtype = params["compute_dtype"]
    Cp, Hp = params["Cp"], params["Hp"]
    N = B * T
    out_dtype = x.dtype if out_dtype is None else out_dtype
    itemsize = jnp.dtype(compute_dtype).itemsize
    out_itemsize = jnp.dtype(out_dtype).itemsize

    # Generation-aware VMEM budget with headroom (v7x: 64 MiB/TC -> ~56 MiB,
    # v5e/v6e: 128 MiB -> ~112 MiB).
    capacity = _vmem_capacity_bytes()
    budget = (capacity * 7) // 8
    est = functools.partial(_estimate_vmem, cp=Cp, itemsize=itemsize,
                            out_itemsize=out_itemsize)

    # --- Row tile ---
    tm = max(8, min(_round_up(tm, 8), _round_up(N, 8)))
    Np = _round_up(N, tm)
    # v7x shards the "parallel" axis across 2 TensorCores: keep >= 2 row tiles.
    while Np // tm < 2 and tm > 8:
        tm = max(8, _round_up(tm // 2, 8))
        Np = _round_up(N, tm)

    # --- Hidden tile: prefer full weight residency (each weight DMA'd once) ---
    if est(tm, Hp) <= budget:
        th = Hp
    else:
        # Streaming weights: arithmetic intensity ~ tm flop/byte, so push tm
        # toward 512 (v6e needs ~650 flop/byte to stay MXU-bound) if rows allow.
        if N >= 1024:
            tm_big = min(512, _round_up(N, 8))
            th_big = _pick_hidden_tile(Hp, th_cap)
            if tm_big > tm and est(tm_big, th_big) <= budget:
                tm = tm_big
        th = _pick_hidden_tile(Hp, th_cap)
        while th > 128 and est(tm, th) > budget:
            th = _pick_hidden_tile(Hp, th - 128)
        while tm > 8 and est(tm, th) > budget:
            tm = max(8, _round_up(tm // 2, 8))
        Np = _round_up(N, tm)

    num_k = Hp // th
    grid = (Np // tm, num_k)
    vmem_limit = int(min(budget, max(2 * est(tm, th) + (8 << 20), 32 << 20)))

    x_p = jnp.pad(x.reshape(N, C).astype(compute_dtype),
                  ((0, Np - N), (0, Cp - C)))
    seed_arr = jnp.asarray([seed], dtype=jnp.int32)

    kernel = functools.partial(_ff_kernel, drop_p=float(drop_p),
                               compute_dtype=compute_dtype, num_k=num_k, tm=tm,
                               use_hw_prng=use_hw_prng)
    scratch_shapes = [] if num_k == 1 else [pltpu.VMEM((tm, Cp), jnp.float32)]

    out_p = pl.pallas_call(
        kernel,
        out_shape=jax.ShapeDtypeStruct((Np, Cp), out_dtype),
        grid_spec=pltpu.PrefetchScalarGridSpec(
            num_scalar_prefetch=0,
            grid=grid,
            in_specs=[
                pl.BlockSpec(memory_space=pltpu.MemorySpace.SMEM),   # dropout seed
                pl.BlockSpec((tm, Cp), lambda i, k: (i, 0)),         # x rows
                pl.BlockSpec((Cp, th), lambda i, k: (0, k)),         # W1 chunk
                pl.BlockSpec((1, th), lambda i, k: (0, k)),          # b1 chunk
                pl.BlockSpec((th, Cp), lambda i, k: (k, 0)),         # W2 chunk
                pl.BlockSpec((1, Cp), lambda i, k: (0, 0)),          # b2
            ],
            out_specs=pl.BlockSpec((tm, Cp), lambda i, k: (i, 0)),
            scratch_shapes=scratch_shapes,
        ),
        compiler_params=pltpu.CompilerParams(
            dimension_semantics=("parallel", "arbitrary"),
            vmem_limit_bytes=vmem_limit,
        ),
    )(seed_arr, x_p, params["w1"], params["b1"], params["w2"], params["b2"])

    return out_p[:N, :C].reshape(B, T, C)


def _init_params(key, n_embd):
    """Deterministic init mimicking nn.Linear's uniform(-1/sqrt(fan_in), ...)."""
    h = 4 * n_embd
    k1, k2, k3, k4 = jax.random.split(key, 4)
    lim1 = 1.0 / (n_embd ** 0.5)
    lim2 = 1.0 / (h ** 0.5)
    w1 = jax.random.uniform(k1, (n_embd, h), jnp.float32, -lim1, lim1)
    b1 = jax.random.uniform(k2, (h,), jnp.float32, -lim1, lim1)
    w2 = jax.random.uniform(k3, (h, n_embd), jnp.float32, -lim2, lim2)
    b2 = jax.random.uniform(k4, (n_embd,), jnp.float32, -lim2, lim2)
    return w1, b1, w2, b2


if __name__ == "__main__":
    B, T, n_embd = 2, 8, 32       # hidden = 4 * n_embd = 128
    dropout = 0.1

    key = jax.random.PRNGKey(0)
    kx, kp = jax.random.split(key)
    x = jax.random.normal(kx, (B, T, n_embd), dtype=jnp.float32)
    w1, b1, w2, b2 = _init_params(kp, n_embd)

    # Weights are padded/cast exactly once and reused across calls.
    params = prepare_ff_params(w1, b1, w2, b2)

    # Eval-mode pass (dropout disabled): check against a bf16-matched reference.
    y_eval = jax.block_until_ready(feed_forward(x, params, drop_p=0.0))
    xb, w1b, w2b = (a.astype(jnp.bfloat16) for a in (x, w1, w2))
    h_ref = jnp.maximum(
        jnp.einsum("btc,ch->bth", xb, w1b, preferred_element_type=jnp.float32) + b1, 0.0)
    ref = jnp.einsum("bth,hc->btc", h_ref.astype(jnp.bfloat16), w2b,
                     preferred_element_type=jnp.float32) + b2
    max_err = float(jnp.max(jnp.abs(y_eval - ref)))
    assert y_eval.shape == ref.shape
    assert jnp.allclose(y_eval, ref, atol=2e-3, rtol=2e-3), f"mismatch (max err {max_err})"

    # Training-mode pass (stochastic dropout via in-kernel counter hash).
    y_train = jax.block_until_ready(
        feed_forward(x, params, drop_p=dropout, seed=1234))
    n_zero = int(jnp.sum(y_train == 0.0))
    assert 0 < n_zero < y_train.size, "dropout mask looks degenerate"

    print("KERNEL_OK")
</pallas_src>

<mosaic_0001>
module attributes {stable_mosaic.version = 11 : i64} {
  func.func @_ff_kernel(%arg0: i32, %arg1: i32, %arg2: memref<1xi32, #tpu.memory_space<smem>>, %arg3: memref<8x128xbf16, #tpu.memory_space<vmem>>, %arg4: memref<128x128xbf16, #tpu.memory_space<vmem>>, %arg5: memref<1x128xf32, #tpu.memory_space<vmem>>, %arg6: memref<128x128xbf16, #tpu.memory_space<vmem>>, %arg7: memref<1x128xf32, #tpu.memory_space<vmem>>, %arg8: memref<8x128xf32, #tpu.memory_space<vmem>>) attributes {dimension_semantics = [#tpu.dimension_semantics<parallel>, #tpu.dimension_semantics<arbitrary>], iteration_bounds = array<i64: 2, 1>, scalar_prefetch = 0 : i64, scratch_operands = 0 : i64, tpu.core_type = #tpu.core_type<tc>, window_params = [{transform_indices = @transform_0, window_bounds = array<i64: 1>}, {transform_indices = @transform_1, window_bounds = array<i64: 8, 128>}, {transform_indices = @transform_2, window_bounds = array<i64: 128, 128>}, {transform_indices = @transform_3, window_bounds = array<i64: 1, 128>}, {transform_indices = @transform_4, window_bounds = array<i64: 128, 128>}, {pipeline_mode = #tpu.pipeline_mode<synchronous>, transform_indices = @transform_5, window_bounds = array<i64: 1, 128>}, {transform_indices = @transform_6, window_bounds = array<i64: 8, 128>}]} {
    %c0 = arith.constant 0 : index
    %c0_0 = arith.constant 0 : index
    %0 = vector.load %arg3[%c0, %c0_0] : memref<8x128xbf16, #tpu.memory_space<vmem>>, vector<8x128xbf16>
    %c0_1 = arith.constant 0 : index
    %c0_2 = arith.constant 0 : index
    %1 = vector.load %arg4[%c0_1, %c0_2] : memref<128x128xbf16, #tpu.memory_space<vmem>>, vector<128x128xbf16>
    %cst = arith.constant dense<0.000000e+00> : vector<8x128xf32>
    %2 = tpu.matmul %0, %1, %cst {dimension_numbers = #tpu.dot_dimension_numbers<[1], [0], [0], [1], [0, 0, 1, 1], [], []>} : vector<8x128xbf16>, vector<128x128xbf16>, vector<8x128xf32> -> vector<8x128xf32>
    %c0_3 = arith.constant 0 : index
    %c0_4 = arith.constant 0 : index
    %3 = vector.load %arg5[%c0_3, %c0_4] : memref<1x128xf32, #tpu.memory_space<vmem>>, vector<1x128xf32>
    %4 = vector.broadcast %3 : vector<1x128xf32> to vector<8x128xf32>
    %5 = arith.addf %2, %4 : vector<8x128xf32>
    %cst_5 = arith.constant 0.000000e+00 : f32
    %6 = vector.broadcast %cst_5 : f32 to vector<8x128xf32>
    %7 = arith.maximumf %5, %6 : vector<8x128xf32>
    %8 = arith.truncf %7 : vector<8x128xf32> to vector<8x128xbf16>
    %c0_6 = arith.constant 0 : index
    %c0_7 = arith.constant 0 : index
    %9 = vector.load %arg6[%c0_6, %c0_7] : memref<128x128xbf16, #tpu.memory_space<vmem>>, vector<128x128xbf16>
    %cst_8 = arith.constant dense<0.000000e+00> : vector<8x128xf32>
    %10 = tpu.matmul %8, %9, %cst_8 {dimension_numbers = #tpu.dot_dimension_numbers<[1], [0], [0], [1], [0, 0, 1, 1], [], []>} : vector<8x128xbf16>, vector<128x128xbf16>, vector<8x128xf32> -> vector<8x128xf32>
    %c0_9 = arith.constant 0 : index
    %c0_10 = arith.constant 0 : index
    %11 = vector.load %arg7[%c0_9, %c0_10] : memref<1x128xf32, #tpu.memory_space<vmem>>, vector<1x128xf32>
    %12 = vector.broadcast %11 : vector<1x128xf32> to vector<8x128xf32>
    %13 = arith.addf %10, %12 : vector<8x128xf32>
    %c0_11 = arith.constant 0 : index
    %c0_12 = arith.constant 0 : index
    %14 = vector.load %arg8[%c0_11, %c0_12] : memref<8x128xf32, #tpu.memory_space<vmem>>, vector<8x128xf32>
    tpu.vector_store %arg8[%c0_11, %c0_12], %13 {strides = array<i32>} : memref<8x128xf32, #tpu.memory_space<vmem>>, vector<8x128xf32>,
    return
  }
  func.func @transform_0(%arg0: i32, %arg1: i32) -> i32 {
    %c0_i32 = arith.constant 0 : i32
    %c0_i32_0 = arith.constant 0 : i32
    return %c0_i32 : i32
  }
  func.func @transform_1(%arg0: i32, %arg1: i32) -> (i32, i32) {
    %c0_i32 = arith.constant 0 : i32
    %c0_i32_0 = arith.constant 0 : i32
    return %arg0, %c0_i32 : i32, i32
  }
  func.func @transform_2(%arg0: i32, %arg1: i32) -> (i32, i32) {
    %c0_i32 = arith.constant 0 : i32
    %c0_i32_0 = arith.constant 0 : i32
    return %c0_i32, %arg1 : i32, i32
  }
  func.func @transform_3(%arg0: i32, %arg1: i32) -> (i32, i32) {
    %c0_i32 = arith.constant 0 : i32
    %c0_i32_0 = arith.constant 0 : i32
    return %c0_i32, %arg1 : i32, i32
  }
  func.func @transform_4(%arg0: i32, %arg1: i32) -> (i32, i32) {
    %c0_i32 = arith.constant 0 : i32
    %c0_i32_0 = arith.constant 0 : i32
    return %arg1, %c0_i32 : i32, i32
  }
  func.func @transform_5(%arg0: i32, %arg1: i32) -> (i32, i32) {
    %c0_i32 = arith.constant 0 : i32
    %c0_i32_0 = arith.constant 0 : i32
    %c0_i32_1 = arith.constant 0 : i32
    return %c0_i32, %c0_i32_0 : i32, i32
  }
  func.func @transform_6(%arg0: i32, %arg1: i32) -> (i32, i32) {
    %c0_i32 = arith.constant 0 : i32
    %c0_i32_0 = arith.constant 0 : i32
    return %arg0, %c0_i32 : i32, i32
  }
}

</mosaic_0001>

<bundles_post_ra>
// kernel: tpu_custom_call.1
= control target key start
LH: loop header
LB: loop body
LE: loop exit
PB: predicated region body
PF: predicated region fallthrough
CT: control target
= control target key end

     0   :  { %12 = vsyncpa [#allocation4], 0  ;;  %s1367_s0 = inlined_call_operand.<no memory space> [shape: s32[1], index: 0, kind: input, shape index: {}]   ;;  %s1368_s1 = inlined_call_operand.hbm [shape: bf16[16,128], index: 1, kind: input, shape index: {}]   ;;  %s1369_s2 = inlined_call_operand.hbm [shape: bf16[128,128], index: 2, kind: input, shape index: {}]   ;;  %s1370_s3 = inlined_call_operand.vmem [shape: f32[1,128], index: 3, kind: input, shape index: {}]   ;;  %s1371_s4 = inlined_call_operand.hbm [shape: bf16[128,128], index: 4, kind: input, shape index: {}]   ;;  %s1372_s5 = inlined_call_operand.vmem [shape: f32[1,128], index: 5, kind: input, shape index: {}]   ;;  %s1373_s6 = inlined_call_operand.hbm [shape: f32[16,128], index: 6, kind: output, shape index: {}]  }
   0x1   :  { %14 = vsyncpa [#allocation4 + $0x1], 0 }
   0x2   :  { %15 = vsyncpa [#allocation7], 0 }
   0x3   :  { %16 = vsyncpa [#allocation5], 0 }
   0x4   :  { %18 = vsyncpa [#allocation5 + $0x1], 0  ;;  %s1107_s0 = smov 0   ;;  %s1109_s21 = smov 0  }
   0x5   :  { %s1111_s22 = smov 0   ;;  %s1113_s23 = smov 0  }
   0x6   :  { %s1115_s24 = smov 0   ;;  %s1117_s25 = smov 0  }
   0x7 LB: > { %s693_s26 = sadd.s32 4294967295, %s1062_s25   ;;  %s694_s27 = sadd.s32 4294967294, %s1062_s25   ;;  %s1062_s25 = sphi %s1117_s25, %s24_s25   ;;  %s1058_s24 = sphi %s1115_s24, %s1395_s24   ;;  %s1054_s23 = sphi %s1113_s23, %s1394_s23   ;;  %s1050_s22 = sphi %s1111_s22, %s1393_s22   ;;  %s1046_s21 = sphi %s1109_s21, %s1392_s21   ;;  %s1042_s0 = sphi %s1107_s0, %s1391_s0  }
   0x8   : > { %p77_p0 = scmp.ne.s32.totalorder %s1046_s21, %s1042_s0  ;;  %p1141_p1 = scmp.eq.s32.totalorder %s693_s26, 0 }
   0x9   : > { %p1145_p2 = scmp.eq.s32.totalorder %s693_s26, 1  ;;  %p206_p3 = scmp.eq.s32.totalorder %s694_s27, 1 }
   0xa   : > { %s1378_s28 = scalar_select %p1141_p1, 1, 0 }
   0xb   : > { %p1151_p4 = por %p1141_p1, %p77_p0  ;;  %p695_p5 = scmp.ge.s32.totalorder %s1062_s25, 1 }
   0xc   : > { %p1156_p6 = por %p206_p3, %p77_p0  ;;  %p213_p7 = scmp.lt.s32.totalorder %s1062_s25, 3 }
   0xd   : > { %s1380_s30 = scalar_select %p1151_p4, 1, 0 }
   0xe   : > { %s1381_s7 = scalar_select %p1156_p6, 1, 0 }
   0xf   : > { %p1161_p8 = pnand %p695_p5, %p213_p7  ;;  %s1064_s9 = smov [#allocation6]  }
  0x10   : > { %s230_s10 = sshll.u32 %s1064_s9, 4  ;;  %s1065_s12 = smov [#allocation8]   ;;  %s1165_s10 = int_to_ptr.vmem [resolvable:$true] %s230_s10 }
  0x11   : > { %p799_p9 = pneg %p1161_p8  ;;  %s252_s13 = sshll.u32 %s1065_s12, 4  ;;  %s1176_s13 = int_to_ptr.vmem [resolvable:$true] %s252_s13 }
  0x12   : > { %s890_s16 = scalar_lea.hbm %s1369_s2, 1024 }
  0x13   : > { %p1172_p11 = pnand %p799_p9, %p1141_p1  ;;  %p891_p12 = scmp.ne.s32.totalorder %s1369_s2, %s890_s16 }
  0x14   : > { %p897_p5 = scmp.lt.u32.totalorder %s890_s16, %s1369_s2 }
  0x15   : > { %p892_p13 = pneg %p1172_p11 }
  0x17   : > { %p893_p0 = pnand %p892_p13, %p891_p12 }
  0x19   : > { %p894_p3 = pneg %p893_p0 }
  0x1b   : > { %p899_p7 = pnand %p897_p5, %p894_p3 }
  0x1d   : > { %902 = shalt.err (!%p899_p7)
}
  0x1e   : > { %s903_s26 = scalar_lea.vmem %s1165_s10, 1024  ;;  %p911_p1 = scmp.lt.s32.totalorder %s1165_s10, %s1165_s10 }
  0x1f   : > { %p904_p9 = scmp.ne.s32.totalorder %s1165_s10, %s903_s26  ;;  %p912_p12 = scmp.lt.s32.totalorder %s903_s26, %s903_s26 }
  0x21   : > { %p906_p10 = pnand %p904_p9, %p892_p13  ;;  %p913_p0 = por %p912_p12, %p911_p1 }
  0x23   : > { %p907_p6 = pneg %p906_p10 }
  0x25   : > { %p914_p4 = pnand %p913_p0, %p907_p6 }
  0x27   : > { %917 = shalt.err (!%p914_p4)
}
  0x28   : > { %s1066_s27 = smov 64   ;;  %s1067_s9 = smov 4  }
  0x29   : > { %802 = dma.hbm_to_vmem [thread:$0]  (!%p1172_p11), %s1369_s2, 1024, %s1165_s10, [#allocation7], %s1066_s27, %s1066_s27, %s1067_s9  }
  0x2a   : > { %s918_s17 = scalar_lea.hbm %s1371_s4, 1024 }
  0x2b   : > { %p919_p1 = scmp.ne.s32.totalorder %s1371_s4, %s918_s17  ;;  %p925_p10 = scmp.lt.u32.totalorder %s918_s17, %s1371_s4 }
  0x2d   : > { %p921_p4 = pnand %p919_p1, %p892_p13 }
  0x2f   : > { %p922_p6 = pneg %p921_p4 }
  0x31   : > { %p927_p3 = pnand %p925_p10, %p922_p6 }
  0x33   : > { %930 = shalt.err (!%p927_p3)
}
  0x34   : > { %s931_s10 = scalar_lea.vmem %s1176_s13, 1024  ;;  %p939_p12 = scmp.lt.s32.totalorder %s1176_s13, %s1176_s13 }
  0x35   : > { %p932_p5 = scmp.ne.s32.totalorder %s1176_s13, %s931_s10  ;;  %p940_p0 = scmp.lt.s32.totalorder %s931_s10, %s931_s10 }
  0x37   : > { %p934_p7 = pnand %p932_p5, %p892_p13  ;;  %p941_p1 = por %p940_p0, %p939_p12 }
  0x39   : > { %p935_p9 = pneg %p934_p7 }
  0x3b   : > { %p942_p4 = pnand %p941_p1, %p935_p9 }
  0x3d   : > { %945 = shalt.err (!%p942_p4)
}
  0x3e   : > { %805 = dma.hbm_to_vmem [thread:$0]  (!%p1172_p11), %s1371_s4, 1024, %s1176_s13, [#allocation7], %s1066_s27, %s1066_s27, %s1067_s9  }
  0x3f   : > { %s36_s15 = sadd.s32 1, %s1058_s24  ;;  %s64_s16 = sadd.s32 1, %s1050_s22 }
  0x40   : > { %p38_p13 = scmp.ge.s32.totalorder %s36_s15, 2  ;;  %p71_p6 = scmp.ne.s32.totalorder %s1050_s22, %s1046_s21 }
  0x41   : > { %p72_p10 = scmp.eq.s32.totalorder %s1062_s25, 0  ;;  %p816_p3 = scmp.lt.s32.totalorder %s1062_s25, 2 }
  0x42   : > { %s1397_s15 = smov (%p38_p13, %s36_s15), 0  ;;  %p1240_p7 = por %p1145_p2, %p71_p6 }
  0x43   : > { %p73_p5 = por %p72_p10, %p71_p6  ;;  %s61_s17 = ssub.s32 %s1058_s24, %s1397_s15 }
  0x44   : > { %s1384_s11 = scalar_select %p1240_p7, 1, 0 }
  0x45   : > { %s269_s18 = sand.u32 1, %s1050_s22   ;;  %p62_p9 = scmp.eq.s32.totalorder %s61_s17, 0 }
  0x46   : > { %s700_s13 = sshll.u32 %s269_s18, 2  ;;  %s701_s27 = sshll.u32 %s1058_s24, 6 }
  0x47   : > { %s1249_s9 = scalar_select %p62_p9, %s1050_s22, %s64_s16  }
  0x48   : > { %s1254_s26 = scalar_lea.hbm %s1368_s1, %s701_s27  ;;  %s273_s29 = scalar_lea.vmem [#allocation3], %s700_s13 }
  0x49   : > { %s280_s10 = sshll.u32 %s273_s29, 4  ;;  %p1258_p2 = pnand %p816_p3, %p73_p5  ;;  %s1262_s10 = int_to_ptr.vmem [resolvable:$true] %s280_s10 }
  0x4a   : > { %s270_s14 = scalar_lea.sflag [#allocation4], %s269_s18  ;;  %s946_s16 = scalar_lea.hbm %s1254_s26, 64 }
  0x4b   : > { %p947_p11 = scmp.ne.s32.totalorder %s1254_s26, %s946_s16  ;;  %p948_p12 = pneg %p1258_p2 }
  0x4c   : > { %s951_s27 = scalar_lea.hbm %s1368_s1, 128  ;;  %p952_p4 = scmp.lt.u32.totalorder %s1254_s26, %s1368_s1 }
  0x4d   : > { %p949_p0 = pnand %p948_p12, %p947_p11  ;;  %p953_p13 = scmp.lt.u32.totalorder %s951_s27, %s946_s16 }
  0x4e   : > { %p955_p10 = scmp.lt.u32.totalorder %s946_s16, %s1254_s26 }
  0x4f   : > { %p950_p1 = pneg %p949_p0  ;;  %p954_p6 = por %p953_p13, %p952_p4 }
  0x51   : > { %p956_p3 = por %p955_p10, %p954_p6 }
  0x53   : > { %p957_p5 = pnand %p956_p3, %p950_p1 }
  0x55   : > { %960 = shalt.err (!%p957_p5)
}
  0x56   : > { %s961_s18 = scalar_lea.vmem %s1262_s10, 64  ;;  %s1068_s29 = smov [#allocation3]  }
  0x57   : > { %p962_p9 = scmp.ne.s32.totalorder %s1262_s10, %s961_s18  ;;  %s966_s17 = sshll.u32 %s1068_s29, 4  ;;  %s967_s17 = int_to_ptr.vmem [resolvable:$false] %s966_s17 }
  0x58   : > { %s968_s13 = scalar_lea.vmem %s967_s17, 128  ;;  %p969_p7 = scmp.lt.s32.totalorder %s1262_s10, %s967_s17 }
  0x59   : > { %p964_p11 = pnand %p962_p9, %p948_p12  ;;  %p970_p4 = scmp.lt.s32.totalorder %s968_s13, %s961_s18 }
  0x5b   : > { %p965_p0 = pneg %p964_p11  ;;  %p971_p13 = por %p970_p4, %p969_p7 }
  0x5d   : > { %p972_p6 = pnand %p971_p13, %p965_p0 }
  0x5f   : > { %975 = shalt.err (!%p972_p6)
}
  0x60   : > { %809 = dma.hbm_to_vmem [thread:$0]  (!%p1258_p2), %s1254_s26, 64, %s1262_s10, %s270_s14  }
  0x61   : > { %289 = sbr.rel (%p1161_p8) target bundleno = 588 (0x24c), region = 44  ;;  %s1292_s16 = sand.u32 (!%p1161_p8), 1, %s1046_s21  }
  0x62   : > { %s703_s27 = sshll.u32 (!%p1161_p8), %s1292_s16, 2  ;;  %s292_s19 = scalar_lea.sflag (!%p1161_p8), [#allocation4], %s1292_s16 }
  0x63   : > { %s1296_s20 = scalar_lea.vmem (!%p1161_p8), [#allocation3], %s703_s27  ;;  %p1386_p7 = scmp.ne.s32.totalorder (!%p1161_p8), %s1380_s30, 0 }
  0x68   : > { %1029 = dma.done.wait (%p1386_p7), %s292_s19, 64  }
  0x69   : > { %1031 = vsyncadd (%p1386_p7), %s292_s19, 4294967232  ;;  %p1387_p2 = scmp.ne.s32.totalorder %s1378_s28, 0 }
  0x6b   : > { %1033 = dma.done.wait (%p1387_p2), [#allocation7], 2048  }
  0x6c   : > { %1035 = vsyncadd (%p1387_p2), [#allocation7], 4294965248  ;;  %v1069_v0 = vmov 0.0   ;;  %vm1070_vm0 = vmmov 0   ;;  %v874_v1 = vld [vmem:[#allocation6] sm:$0xff]   ;;  %v875_v2 = vld [vmem:[#allocation6 + $0x8] sm:$0xff]  }
  0x6d   : > { %747 = vmatprep.subr.bf16.mxu0 %v1069_v0  ;;  %763 = vmatprep.mubr.msk.bf16.mxu0 %vm1070_vm0, %v1069_v0  ;;  %v876_v3 = vld [vmem:[#allocation6 + $0x10] sm:$0xff]   ;;  %v882_v4 = vld [vmem:[#allocation8] sm:$0xff]   ;;  %v877_v5 = vld [vmem:[#allocation6 + $0x18] sm:$0xff]   ;;  %s706_s8 = sshll.u32 %s1292_s16, 3  ;;  %s726_s12 = sshll.u32 %s1054_s23, 7 }
  0x6e   : > { %767 = vmatprep.subr.bf16.mxu1 %v1069_v0  ;;  %783 = vmatprep.mubr.msk.bf16.mxu1 %vm1070_vm0, %v1069_v0  ;;  %v883_v6 = vld [vmem:[#allocation8 + $0x8] sm:$0xff]   ;;  %v878_v7 = vld [vmem:[#allocation6 + $0x20] sm:$0xff]   ;;  %v884_v8 = vld [vmem:[#allocation8 + $0x10] sm:$0xff]   ;;  %s334_s14 = scalar_lea.vmem [#allocation9], %s706_s8  ;;  %s1318_s13 = scalar_lea.hbm %s1373_s6, %s726_s12 }
  0x6f   : > { %748 = vmatpush3.bf16.msra.mxu0 %v874_v1  ;;  %768 = vmatpush3.bf16.msra.mxu1 %v882_v4  ;;  %v879_v9 = vld [vmem:[#allocation6 + $0x28] sm:$0xff]   ;;  %v885_v10 = vld [vmem:[#allocation8 + $0x18] sm:$0xff]   ;;  %v880_v11 = vld [vmem:[#allocation6 + $0x30] sm:$0xff]   ;;  %s580_s18 = sshll.u32 %s334_s14, 4  ;;  %s567_s27 = scalar_lea.sflag [#allocation5], %s1292_s16  ;;  %s1320_s18 = int_to_ptr.vmem [resolvable:$true] %s580_s18 }
  0x70   : > { %749 = vmatprep.subr.bf16.mxu0 %v1069_v0  ;;  %769 = vmatprep.subr.bf16.mxu1 %v1069_v0  ;;  %v886_v12 = vld [vmem:[#allocation8 + $0x20] sm:$0xff]   ;;  %v881_v13 = vld [vmem:[#allocation6 + $0x38] sm:$0xff]   ;;  %v887_v14 = vld [vmem:[#allocation8 + $0x28] sm:$0xff]   ;;  %s976_s23 = scalar_lea.vmem %s1320_s18, 128  ;;  %p1388_p12 = scmp.ne.s32.totalorder %s1384_s11, 0 }
  0x71   : > { %v340_v15 = vld [vmem:[%s1296_s20] sm:$0xf]  ;;  %v888_v16 = vld [vmem:[#allocation8 + $0x30] sm:$0xff]   ;;  %p977_p8 = scmp.ne.s32.totalorder %s1320_s18, %s976_s23  ;;  %s1071_s19 = smov [#allocation9]  }
  0x72   : > { %v889_v17 = vld [vmem:[#allocation8 + $0x38] sm:$0xff]   ;;  %s980_s20 = sshll.u32 %s1071_s19, 4  ;;  %s981_s20 = int_to_ptr.vmem [resolvable:$false] %s980_s20 }
  0x73   : > { %750 = vmatpush3.bf16.msra.mxu0 %v875_v2  ;;  %770 = vmatpush3.bf16.msra.mxu1 %v883_v6  ;;  %v707_v18 = vld [vmem:[%s1370_s3] ss:$0 sm:$0xff]  ;;  %p978_p1 = pnand %p977_p8, %p1388_p12  ;;  %s982_s28 = scalar_lea.vmem %s981_s20, 256 }
  0x74   : > { %751 = vmatprep.subr.bf16.mxu0 %v1069_v0  ;;  %771 = vmatprep.subr.bf16.mxu1 %v1069_v0  ;;  %v716_v26 = vld [vmem:[%s1372_s5] ss:$0 sm:$0xff]  ;;  %p983_p3 = scmp.lt.s32.totalorder %s1320_s18, %s981_s20  ;;  %p984_p5 = scmp.lt.s32.totalorder %s982_s28, %s976_s23 }
  0x75   : > { %p979_p10 = pneg %p978_p1 }
  0x76   : > { %p985_p9 = por %p984_p5, %p983_p3 }
  0x77   : > { %752 = vmatpush3.bf16.msra.mxu0 %v876_v3  ;;  %772 = vmatpush3.bf16.msra.mxu1 %v884_v8 }
  0x78   : > { %753 = vmatprep.subr.bf16.mxu0 %v1069_v0  ;;  %773 = vmatprep.subr.bf16.mxu1 %v1069_v0  ;;  %p986_p11 = pnand %p985_p9, %p979_p10 }
  0x7b   : > { %754 = vmatpush3.bf16.msra.mxu0 %v877_v5  ;;  %774 = vmatpush3.bf16.msra.mxu1 %v885_v10 }
  0x7c   : > { %755 = vmatprep.subr.bf16.mxu0 %v1069_v0  ;;  %775 = vmatprep.subr.bf16.mxu1 %v1069_v0 }
  0x7f   : > { %756 = vmatpush3.bf16.msra.mxu0 %v878_v7  ;;  %776 = vmatpush3.bf16.msra.mxu1 %v886_v12 }
  0x80   : > { %757 = vmatprep.subr.bf16.mxu0 %v1069_v0  ;;  %777 = vmatprep.subr.bf16.mxu1 %v1069_v0 }
  0x83   : > { %758 = vmatpush3.bf16.msra.mxu0 %v879_v9  ;;  %778 = vmatpush3.bf16.msra.mxu1 %v887_v14 }
  0x84   : > { %759 = vmatprep.subr.bf16.mxu0 %v1069_v0  ;;  %779 = vmatprep.subr.bf16.mxu1 %v1069_v0 }
  0x87   : > { %760 = vmatpush3.bf16.msra.mxu0 %v880_v11  ;;  %780 = vmatpush3.bf16.msra.mxu1 %v888_v16 }
  0x88   : > { %761 = vmatprep.subr.bf16.mxu0 %v1069_v0  ;;  %781 = vmatprep.subr.bf16.mxu1 %v1069_v0 }
  0x8b   : > { %762 = vmatpush3.bf16.msra.mxu0 %v881_v13  ;;  %782 = vmatpush3.bf16.msra.mxu1 %v889_v17 }
  0x8e   : > { %764 = vmatmul.mubr.bf16.vlgmr.msra.gmra.mrb[0].mxu0 %v340_v15 }
 0x161   : > { %v446_v19 = vpop.f32.mrb[0].mxu0 }
 0x162   : > { %v447_v20 = vadd.f32 %v707_v18, %v446_v19  ;;  %v765_v21 = vpop.f32.mrb[1].mxu0 }
 0x163   : > { %v449_v22 = vpop.f32.mrb[2].mxu0 }
 0x164   : > { %v452_v23 = vmax.f32 %v447_v20, 0.0  ;;  %v766_v24 = vpop.f32.mrb[3].mxu0 }
 0x166   : > { %v453_v25 = vpack.c.bf16 %v452_v23, %v452_v23 }
 0x168   : > { %784 = vmatmul.mubr.bf16.vlgmr.msra.gmra.mrb[0].mxu1 %v453_v25 }
 0x23b   : > { %v559_v27 = vpop.f32.mrb[0].mxu1 }
 0x23c   : > { %v560_v28 = vadd.f32 %v716_v26, %v559_v27  ;;  %v785_v29 = vpop.f32.mrb[1].mxu1 }
 0x23d   : > { %v562_v30 = vpop.f32.mrb[2].mxu1 }
 0x23e   : > { %565 = vst [vmem:[%s334_s14] sm:$0xff] %v560_v28  ;;  %v786_v31 = vpop.f32.mrb[3].mxu1 }
 0x23f   : > { %989 = shalt.err (!%p986_p11)
}
 0x240   : > { %s990_s16 = scalar_lea.hbm %s1318_s13, 128  ;;  %s994_s26 = scalar_lea.hbm %s1373_s6, 256 }
 0x241   : > { %p991_p0 = scmp.ne.s32.totalorder %s1318_s13, %s990_s16  ;;  %p995_p6 = scmp.lt.u32.totalorder %s1318_s13, %s1373_s6 }
 0x242   : > { %p996_p7 = scmp.lt.u32.totalorder %s994_s26, %s990_s16  ;;  %p998_p8 = scmp.lt.u32.totalorder %s990_s16, %s1318_s13 }
 0x243   : > { %p992_p4 = pnand %p991_p0, %p1388_p12 }
 0x244   : > { %p997_p2 = por %p996_p7, %p995_p6 }
 0x245   : > { %p993_p13 = pneg %p992_p4 }
 0x246   : > { %p999_p1 = por %p998_p8, %p997_p2 }
 0x248   : > { %p1000_p10 = pnand %p999_p1, %p993_p13 }
 0x24a   : > { %1003 = shalt.err (!%p1000_p10)
}
 0x24b   : > { %797 = dma.vmem_to_hbm [thread:$0]  (%p1388_p12), %s1320_s18, 128, %s1318_s13, %s567_s27  }
 0x24c PF: > { %s592_s14 = sand.u32 1, %s1042_s0   ;;  %p1389_p3 = scmp.ne.s32.totalorder %s1381_s7, 0 }
 0x24d   : > { %p1390_p5 = scmp.ge.s32.totalorder %s1062_s25, 2  ;;  %s593_s29 = scalar_lea.sflag [#allocation5], %s592_s14 }
 0x24f   : > { %p811_p9 = pnand %p1390_p5, %p1389_p3 }
 0x251   : > { %1037 = dma.done.wait (!%p811_p9), %s593_s29, 128  }
 0x252   : > { %1039 = vsyncadd (!%p811_p9), %s593_s29, 4294967168  ;;  %s24_s25 = sadd.s32 1, %s1062_s25   ;;  %s1391_s0 = smov %s1046_s21 }
 0x253   : > { %p21_p11 = scmp.ge.s32.totalorder %s24_s25, 4   ;;  %s1392_s21 = smov %s1050_s22 }
 0x254   : > { %s1393_s22 = smov %s1249_s9  ;;  %s1394_s23 = smov %s1058_s24 }
 0x255   : > { %s1395_s24 = smov %s1397_s15  ;;  %23 = sbr.rel (!%p21_p11) target bundleno = 7 (0x7), region = 102 }
 0x25c   :  { %598 = vsyncpa [#allocation4], 1 }
 0x25d   :  { %600 = vsyncpa [#allocation4 + $0x1], 1 }
 0x25e   :  { %601 = vsyncpa [#allocation7], 1 }
 0x25f   :  { %602 = vsyncpa [#allocation5], 1 }
 0x260   :  { %604 = vsyncpa [#allocation5 + $0x1], 1 }

</bundles_post_ra>
